<compile_context>
chip_gen: v7x
topology: tpu7x:2x2x1
jax: 0.10.0
libtpu: 0.0.40
codegen_flags: <defaults>
</compile_context>

<pallas_src>
import functools

import jax
import jax.numpy as jnp
from jax.experimental import pallas as pl
from jax.experimental.pallas import tpu as pltpu


def _focal_loss_kernel(logits_ref, label_ref, out_ref, *, alpha, gamma, hw,
                       tile_cols, num_classes):
    t = pl.program_id(1)

    @pl.when(t == 0)
    def _():
        out_ref[...] = jnp.zeros_like(out_ref)

    x = logits_ref[0].astype(jnp.float32)            # (C, TC): classes x pixels
    lab = label_ref[0]                               # (1, TC) int32

    # Numerically-stable softmax cross-entropy, reduced over class (sublane) axis.
    m = jnp.max(x, axis=0, keepdims=True)            # (1, TC)
    e = jnp.exp(x - m)                               # (C, TC)
    sumexp = jnp.sum(e, axis=0, keepdims=True)       # (1, TC)

    # True-class logit via a single select (no one-hot astype + multiply).
    cls_iota = jax.lax.broadcasted_iota(jnp.int32, x.shape, 0)
    x_y = jnp.sum(jnp.where(cls_iota == lab, x, 0.0), axis=0, keepdims=True)

    ce = (m - x_y) + jnp.log(sumexp)                 # (1, TC)
    pt = jnp.exp(-ce)                                # (1, TC), EUP; == softmax prob

    d = 1.0 - pt
    ig = int(gamma)
    if float(gamma) == 0.0:
        mod = jnp.ones_like(d)
    elif float(ig) == float(gamma) and 1 <= ig <= 8:
        # Integer gamma -> plain VPU multiplies on a (1, TC) row; avoids
        # exp(gamma*log(0)) when ce == 0 and keeps the EUP free.
        mod = d
        for _ in range(ig - 1):
            mod = mod * d
    else:
        # TODO(synk): non-integer gamma falls back to a transcendental pow.
        mod = jnp.power(jnp.maximum(d, 0.0), gamma)
    focal = (alpha * mod) * ce                       # (1, TC)

    # Mask the ragged final spatial tile (OOB padded garbage) and any labels
    # outside [0, C) (ignore-index pixels contribute zero, like F.cross_entropy).
    col = jax.lax.broadcasted_iota(jnp.int32, focal.shape, 1)
    in_bounds = (t * tile_cols + col) < hw
    valid_lab = (lab >= 0) & (lab < num_classes)
    contrib = jnp.where(in_bounds & valid_lab, focal, 0.0)

    # Per-lane partial sums accumulated in the resident output block.
    out_ref[...] += contrib.reshape(out_ref.shape)


def _vmem_capacity_bytes():
    try:
        return int(pltpu.get_tpu_info().vmem_capacity_bytes)
    except Exception:
        # Unknown part: assume the smaller (v7x-class) VMEM and be conservative.
        return 64 * 1024 * 1024


def focal_loss(cls_score, label, *, alpha=1.0, gamma=2.0, loss_weight=1.0,
               reduction="mean", target_block_bytes=None, vmem_limit_bytes=None):
    """cls_score: (N, C, H, W) float; label: (N, H, W) int. Returns scalar loss.

    Supports reduction in {'mean', 'sum'}.
    """
    N, C, H, W = cls_score.shape
    HW = H * W

    # Generation-aware defaults: block size / scoped-VMEM limit sized against
    # the f32 working set (all intermediates are f32 regardless of input dtype).
    vmem_cap = _vmem_capacity_bytes()
    if vmem_cap <= 64 * 1024 * 1024:          # v7x-class: 64 MiB physical VMEM
        tgt = 2 * 1024 * 1024 if target_block_bytes is None else target_block_bytes
        vlim = 48 * 1024 * 1024 if vmem_limit_bytes is None else vmem_limit_bytes
    else:                                     # v5e / v6e: 128 MiB physical VMEM
        tgt = 4 * 1024 * 1024 if target_block_bytes is None else target_block_bytes
        vlim = 64 * 1024 * 1024 if vmem_limit_bytes is None else vmem_limit_bytes

    # Free views of the NCHW tensors -- no transpose / extra HBM pass.
    logits = cls_score.reshape(N, C, HW)
    labels = label.reshape(N, 1, HW).astype(jnp.int32)

    # Spatial tile width: lane-dense (multiple of 128), sized so one f32
    # (C, tile_cols) working block is ~tgt bytes. A 128-multiple block last-dim
    # is legal even when it doesn't divide HW; the ragged tail is lane-masked.
    if HW < 128:
        tile_cols = HW                        # single full-width tile (legal: == dim)
    else:
        cols = max(128, (tgt // (4 * C)) // 128 * 128)
        tile_cols = min(cols, (HW // 128) * 128)
    num_t = pl.cdiv(HW, tile_cols)

    kernel = functools.partial(
        _focal_loss_kernel, alpha=float(alpha), gamma=float(gamma),
        hw=HW, tile_cols=tile_cols, num_classes=C)

    partials = pl.pallas_call(
        kernel,
        out_shape=jax.ShapeDtypeStruct((N, 1, tile_cols), jnp.float32),
        grid_spec=pltpu.PrefetchScalarGridSpec(
            num_scalar_prefetch=0,
            grid=(N, num_t),
            in_specs=[
                pl.BlockSpec((1, C, tile_cols), lambda n, t: (n, 0, t)),
                pl.BlockSpec((1, 1, tile_cols), lambda n, t: (n, 0, t)),
            ],
            out_specs=pl.BlockSpec((1, 1, tile_cols), lambda n, t: (n, 0, 0)),
        ),
        compiler_params=pltpu.CompilerParams(
            # Batch axis can be sharded across TensorCores (megacore); the
            # spatial axis is the sequential reduction axis.
            dimension_semantics=("parallel", "arbitrary"),
            vmem_limit_bytes=vlim,
        ),
    )(logits, labels)

    total = jnp.sum(partials)                        # tiny final reduce in XLA
    if reduction == "mean":
        red = total / jnp.float32(N * HW)
    elif reduction == "sum":
        red = total
    else:
        # TODO(synk): reduction='none' would require returning the per-pixel map.
        raise NotImplementedError("reduction='none' not supported by this wrapper")
    return loss_weight * red


def _reference(cls_score, label, alpha=1.0, gamma=2.0, loss_weight=1.0):
    # Pure-JAX reference matching the PyTorch module's default (softmax-CE) path.
    logits = jnp.transpose(cls_score, (0, 2, 3, 1)).astype(jnp.float32)  # NHWC
    logp = jax.nn.log_softmax(logits, axis=-1)
    ce = -jnp.take_along_axis(logp, label[..., None], axis=-1)[..., 0]
    pt = jnp.exp(-ce)
    focal = alpha * (1.0 - pt) ** gamma * ce
    return loss_weight * jnp.mean(focal)


if __name__ == "__main__":
    key = jax.random.PRNGKey(0)
    k1, k2 = jax.random.split(key)
    N, C, H, W = 2, 4, 16, 16
    cls_score = jax.random.normal(k1, (N, C, H, W), dtype=jnp.float32)
    label = jax.random.randint(k2, (N, H, W), 0, C, dtype=jnp.int32)

    out = focal_loss(cls_score, label)
    out = jax.block_until_ready(out)

    ref = _reference(cls_score, label)
    assert jnp.allclose(out, ref, rtol=1e-5, atol=1e-5), (out, ref)
    print("KERNEL_OK")
</pallas_src>

<mosaic_0001>
module attributes {stable_mosaic.version = 11 : i64} {
  func.func @_focal_loss_kernel(%arg0: i32, %arg1: i32, %arg2: memref<1x4x256xf32, #tpu.memory_space<vmem>>, %arg3: memref<1x1x256xi32, #tpu.memory_space<vmem>>, %arg4: memref<1x1x256xf32, #tpu.memory_space<vmem>>) attributes {dimension_semantics = [#tpu.dimension_semantics<parallel>, #tpu.dimension_semantics<arbitrary>], iteration_bounds = array<i64: 2, 1>, scalar_prefetch = 0 : i64, scratch_operands = 0 : i64, tpu.core_type = #tpu.core_type<tc>, window_params = [{transform_indices = @transform_0, window_bounds = array<i64: 1, 4, 256>}, {transform_indices = @transform_1, window_bounds = array<i64: 1, 1, 256>}, {transform_indices = @transform_2, window_bounds = array<i64: 1, 1, 256>}]} {
    %c0_i32 = arith.constant 0 : i32
    %0 = arith.cmpi eq, %arg1, %c0_i32 : i32
    %1 = arith.extui %0 : i1 to i32
    %c0_i32_0 = arith.constant 0 : i32
    %2 = arith.cmpi ne, %1, %c0_i32_0 : i32
    scf.if %2 {
      %cst_21 = arith.constant 0.000000e+00 : f32
      %51 = vector.broadcast %cst_21 : f32 to vector<1x1x256xf32>
      %c0_22 = arith.constant 0 : index
      %c0_23 = arith.constant 0 : index
      %c0_24 = arith.constant 0 : index
      %52 = vector.load %arg4[%c0_22, %c0_23, %c0_24] : memref<1x1x256xf32, #tpu.memory_space<vmem>>, vector<1x1x256xf32>
      tpu.vector_store %arg4[%c0_22, %c0_23, %c0_24], %51 {strides = array<i32>} : memref<1x1x256xf32, #tpu.memory_space<vmem>>, vector<1x1x256xf32>,
    } else {
    }
    %c0 = arith.constant 0 : index
    %c0_1 = arith.constant 0 : index
    %c0_2 = arith.constant 0 : index
    %3 = vector.load %arg2[%c0, %c0_1, %c0_2] : memref<1x4x256xf32, #tpu.memory_space<vmem>>, vector<1x4x256xf32>
    %4 = vector.shape_cast %3 : vector<1x4x256xf32> to vector<4x256xf32>
    %c0_3 = arith.constant 0 : index
    %c0_4 = arith.constant 0 : index
    %c0_5 = arith.constant 0 : index
    %5 = vector.load %arg3[%c0_3, %c0_4, %c0_5] : memref<1x1x256xi32, #tpu.memory_space<vmem>>, vector<1x1x256xi32>
    %6 = vector.shape_cast %5 : vector<1x1x256xi32> to vector<1x256xi32>
    %cst = arith.constant dense<0xFF800000> : vector<256xf32>
    %7 = vector.multi_reduction <maximumf>, %4, %cst [0] : vector<4x256xf32> to vector<256xf32>
    %8 = vector.shape_cast %7 : vector<256xf32> to vector<1x256xf32>
    %9 = vector.broadcast %8 : vector<1x256xf32> to vector<4x256xf32>
    %10 = arith.subf %4, %9 : vector<4x256xf32>
    %11 = math.exp %10 : vector<4x256xf32>
    %cst_6 = arith.constant dense<0.000000e+00> : vector<256xf32>
    %12 = vector.multi_reduction <add>, %11, %cst_6 [0] : vector<4x256xf32> to vector<256xf32>
    %13 = vector.shape_cast %12 : vector<256xf32> to vector<1x256xf32>
    %14 = tpu.iota {dimensions = array<i32: 0>} : vector<4x256xi32>
    %15 = vector.broadcast %6 : vector<1x256xi32> to vector<4x256xi32>
    %16 = arith.cmpi eq, %14, %15 : vector<4x256xi32>
    %cst_7 = arith.constant 0.000000e+00 : f32
    %17 = vector.broadcast %cst_7 : f32 to vector<4x256xf32>
    %18 = arith.select %16, %4, %17 : vector<4x256xi1>, vector<4x256xf32>
    %cst_8 = arith.constant dense<0.000000e+00> : vector<256xf32>
    %19 = vector.multi_reduction <add>, %18, %cst_8 [0] : vector<4x256xf32> to vector<256xf32>
    %20 = vector.shape_cast %19 : vector<256xf32> to vector<1x256xf32>
    %21 = arith.subf %8, %20 : vector<1x256xf32>
    %22 = math.log %13 : vector<1x256xf32>
    %23 = arith.addf %21, %22 : vector<1x256xf32>
    %cst_9 = arith.constant 0.000000e+00 : f32
    %24 = vector.broadcast %cst_9 : f32 to vector<1x256xf32>
    %25 = arith.subf %24, %23 : vector<1x256xf32>
    %26 = math.exp %25 : vector<1x256xf32>
    %cst_10 = arith.constant 1.000000e+00 : f32
    %27 = vector.broadcast %cst_10 : f32 to vector<1x256xf32>
    %28 = arith.subf %27, %26 : vector<1x256xf32>
    %29 = arith.mulf %28, %28 : vector<1x256xf32>
    %cst_11 = arith.constant 1.000000e+00 : f32
    %30 = vector.broadcast %cst_11 : f32 to vector<1x256xf32>
    %31 = arith.mulf %30, %29 : vector<1x256xf32>
    %32 = arith.mulf %31, %23 : vector<1x256xf32>
    %33 = tpu.iota {dimensions = array<i32: 1>} : vector<1x256xi32>
    %c256_i32 = arith.constant 256 : i32
    %34 = arith.muli %arg1, %c256_i32 : i32
    %35 = vector.broadcast %34 : i32 to vector<1x256xi32>
    %36 = arith.addi %35, %33 : vector<1x256xi32>
    %c256_i32_12 = arith.constant 256 : i32
    %37 = vector.broadcast %c256_i32_12 : i32 to vector<1x256xi32>
    %38 = arith.cmpi slt, %36, %37 : vector<1x256xi32>
    %c0_i32_13 = arith.constant 0 : i32
    %39 = vector.broadcast %c0_i32_13 : i32 to vector<1x256xi32>
    %40 = arith.cmpi sge, %6, %39 : vector<1x256xi32>
    %c4_i32 = arith.constant 4 : i32
    %41 = vector.broadcast %c4_i32 : i32 to vector<1x256xi32>
    %42 = arith.cmpi slt, %6, %41 : vector<1x256xi32>
    %43 = arith.andi %40, %42 : vector<1x256xi1>
    %44 = arith.andi %38, %43 : vector<1x256xi1>
    %cst_14 = arith.constant 0.000000e+00 : f32
    %45 = vector.broadcast %cst_14 : f32 to vector<1x256xf32>
    %46 = arith.select %44, %32, %45 : vector<1x256xi1>, vector<1x256xf32>
    %c0_15 = arith.constant 0 : index
    %c0_16 = arith.constant 0 : index
    %c0_17 = arith.constant 0 : index
    %47 = vector.load %arg4[%c0_15, %c0_16, %c0_17] : memref<1x1x256xf32, #tpu.memory_space<vmem>>, vector<1x1x256xf32>
    %48 = vector.shape_cast %46 : vector<1x256xf32> to vector<1x1x256xf32>
    %49 = arith.addf %47, %48 : vector<1x1x256xf32>
    %c0_18 = arith.constant 0 : index
    %c0_19 = arith.constant 0 : index
    %c0_20 = arith.constant 0 : index
    %50 = vector.load %arg4[%c0_18, %c0_19, %c0_20] : memref<1x1x256xf32, #tpu.memory_space<vmem>>, vector<1x1x256xf32>
    tpu.vector_store %arg4[%c0_18, %c0_19, %c0_20], %49 {strides = array<i32>} : memref<1x1x256xf32, #tpu.memory_space<vmem>>, vector<1x1x256xf32>,
    return
  }
  func.func @transform_0(%arg0: i32, %arg1: i32) -> (i32, i32, i32) {
    %c0_i32 = arith.constant 0 : i32
    %c0_i32_0 = arith.constant 0 : i32
    return %arg0, %c0_i32, %arg1 : i32, i32, i32
  }
  func.func @transform_1(%arg0: i32, %arg1: i32) -> (i32, i32, i32) {
    %c0_i32 = arith.constant 0 : i32
    %c0_i32_0 = arith.constant 0 : i32
    return %arg0, %c0_i32, %arg1 : i32, i32, i32
  }
  func.func @transform_2(%arg0: i32, %arg1: i32) -> (i32, i32, i32) {
    %c0_i32 = arith.constant 0 : i32
    %c0_i32_0 = arith.constant 0 : i32
    %c0_i32_1 = arith.constant 0 : i32
    return %arg0, %c0_i32, %c0_i32_0 : i32, i32, i32
  }
}

</mosaic_0001>

<bundles_post_ra>
// kernel: tpu_custom_call.1
= control target key start
LH: loop header
LB: loop body
LE: loop exit
PB: predicated region body
PF: predicated region fallthrough
CT: control target
= control target key end

     0   :  { %7 = vsyncpa [#allocation3], 0  ;;  %s1017_s0 = inlined_call_operand.hbm [shape: f32[2,4,256], index: 0, kind: input, shape index: {}]   ;;  %s1018_s1 = inlined_call_operand.hbm [shape: s32[2,1,256], index: 1, kind: input, shape index: {}]   ;;  %s1019_s2 = inlined_call_operand.hbm [shape: f32[2,1,256], index: 2, kind: output, shape index: {}]  }
   0x1   :  { %9 = vsyncpa [#allocation3 + $0x1], 0 }
   0x2   :  { %10 = vsyncpa [#allocation6], 0 }
   0x3   :  { %12 = vsyncpa [#allocation6 + $0x1], 0 }
   0x4   :  { %13 = vsyncpa [#allocation4], 0 }
   0x5   :  { %15 = vsyncpa [#allocation4 + $0x1], 0  ;;  %s767_s9 = smov 0   ;;  %s769_s10 = smov 0  }
   0x6   :  { %s771_s11 = smov 0   ;;  %s773_s12 = smov 0  }
   0x7   :  { %s775_s13 = smov 0   ;;  %s777_s14 = smov 0  }
   0x8 LB: > { %s495_s15 = sadd.s32 4294967295, %s744_s14   ;;  %s496_s16 = sadd.s32 4294967294, %s744_s14   ;;  %s744_s14 = sphi %s777_s14, %s21_s14   ;;  %s740_s13 = sphi %s775_s13, %s1041_s13   ;;  %s736_s12 = sphi %s773_s12, %s1040_s12   ;;  %s732_s11 = sphi %s771_s11, %s1039_s11   ;;  %s728_s10 = sphi %s769_s10, %s1038_s10   ;;  %s724_s9 = sphi %s767_s9, %s1037_s9  }
   0x9   : > { %s33_s17 = sadd.s32 1, %s740_s13  ;;  %s42_s18 = sadd.s32 1, %s732_s11 }
   0xa   : > { %p35_p0 = scmp.ge.s32.totalorder %s33_s17, 2  ;;  %p49_p1 = scmp.ne.s32.totalorder %s732_s11, %s728_s10 }
   0xb   : > { %p50_p2 = scmp.eq.s32.totalorder %s744_s14, 0  ;;  %p55_p3 = scmp.ne.s32.totalorder %s728_s10, %s724_s9 }
   0xc   : > { %s1043_s17 = smov (%p35_p0, %s33_s17), 0  ;;  %p56_p5 = scmp.eq.s32.totalorder %s495_s15, 0 }
   0xd   : > { %p808_p4 = por %p50_p2, %p49_p1  ;;  %s37_s20 = ssub.s32 %s740_s13, %s1043_s17 }
   0xe   : > { %p107_p6 = scmp.eq.s32.totalorder %s495_s15, 1  ;;  %p40_p7 = scmp.eq.s32.totalorder %s37_s20, 0 }
   0xf   : > { %p814_p8 = por %p56_p5, %p55_p3  ;;  %p113_p10 = scmp.eq.s32.totalorder %s496_s16, 1 }
  0x10   : > { %p818_p9 = por %p107_p6, %p49_p1  ;;  %p534_p13 = scmp.lt.s32.totalorder %s744_s14, 2 }
  0x11   : > { %s1023_s21 = scalar_select %p814_p8, 1, 0 }
  0x12   : > { %s1024_s22 = scalar_select %p818_p9, 1, 0 }
  0x13   : > { %s823_s23 = scalar_select %p40_p7, %s732_s11, %s42_s18  }
  0x14   : > { %p825_p11 = por %p113_p10, %p55_p3  ;;  %s832_s25 = sand.u32 1, %s732_s11  }
  0x15   : > { %s499_s26 = sshll.u32 %s832_s25, 3  ;;  %s514_s27 = sshll.u32 %s740_s13, 7 }
  0x16   : > { %s1025_s24 = scalar_select %p825_p11, 1, 0 }
  0x17   : > { %s839_s30 = scalar_lea.hbm %s1017_s0, %s514_s27  ;;  %s137_s3 = scalar_lea.vmem [#allocation2], %s499_s26 }
  0x18   : > { %s147_s4 = sshll.u32 %s137_s3, 4  ;;  %p845_p0 = pnand %p534_p13, %p808_p4  ;;  %s841_s4 = int_to_ptr.vmem [resolvable:$true] %s147_s4 }
  0x19   : > { %s134_s6 = scalar_lea.sflag [#allocation3], %s832_s25  ;;  %s598_s7 = scalar_lea.hbm %s839_s30, 128 }
  0x1a   : > { %p599_p3 = scmp.ne.s32.totalorder %s839_s30, %s598_s7  ;;  %p600_p5 = pneg %p845_p0 }
  0x1b   : > { %s603_s16 = scalar_lea.hbm %s1017_s0, 256  ;;  %p604_p4 = scmp.lt.u32.totalorder %s839_s30, %s1017_s0 }
  0x1c   : > { %p601_p6 = pnand %p600_p5, %p599_p3  ;;  %p605_p10 = scmp.lt.u32.totalorder %s603_s16, %s598_s7 }
  0x1d   : > { %p607_p12 = scmp.lt.u32.totalorder %s598_s7, %s839_s30 }
  0x1e   : > { %p602_p7 = pneg %p601_p6  ;;  %p606_p13 = por %p605_p10, %p604_p4 }
  0x20   : > { %p608_p1 = por %p607_p12, %p606_p13 }
  0x22   : > { %p609_p2 = pnand %p608_p1, %p602_p7 }
  0x24   : > { %612 = shalt.err (!%p609_p2)
}
  0x25   : > { %s613_s20 = scalar_lea.vmem %s841_s4, 128  ;;  %s746_s26 = smov [#allocation2]  }
  0x26   : > { %p614_p3 = scmp.ne.s32.totalorder %s841_s4, %s613_s20  ;;  %s618_s27 = sshll.u32 %s746_s26, 4  ;;  %s619_s27 = int_to_ptr.vmem [resolvable:$false] %s618_s27 }
  0x27   : > { %s620_s28 = scalar_lea.vmem %s619_s27, 256  ;;  %p621_p9 = scmp.lt.s32.totalorder %s841_s4, %s619_s27 }
  0x28   : > { %p616_p6 = pnand %p614_p3, %p600_p5  ;;  %p622_p4 = scmp.lt.s32.totalorder %s620_s28, %s613_s20 }
  0x2a   : > { %p617_p11 = pneg %p616_p6  ;;  %p623_p10 = por %p622_p4, %p621_p9 }
  0x2c   : > { %p624_p12 = pnand %p623_p10, %p617_p11 }
  0x2e   : > { %627 = shalt.err (!%p624_p12)
}
  0x2f   : > { %526 = dma.hbm_to_vmem [thread:$0]  (!%p845_p0), %s839_s30, 128, %s841_s4, %s134_s6  }
  0x30   : > { %p1027_p1 = scmp.lt.s32.totalorder %s744_s14, 3  ;;  %p1028_p2 = scmp.ge.s32.totalorder %s744_s14, 1 }
  0x31   : > { %s502_s3 = sshll.u32 %s832_s25, 1  ;;  %s515_s7 = sshll.u32 %s740_s13, 5 }
  0x32   : > { %p881_p7 = pnand %p1028_p2, %p1027_p1  ;;  %s890_s16 = scalar_lea.hbm %s1018_s1, %s515_s7 }
  0x33   : > { %s158_s18 = scalar_lea.vmem [#allocation5], %s502_s3  ;;  %s155_s30 = scalar_lea.sflag [#allocation6], %s832_s25 }
  0x34   : > { %s1029_s29 = scalar_select %p881_p7, 1, 0 }
  0x35   : > { %s168_s19 = sshll.u32 %s158_s18, 4  ;;  %s628_s4 = scalar_lea.hbm %s890_s16, 32  ;;  %s169_s19 = int_to_ptr.vmem [resolvable:$true] %s168_s19 }
  0x36   : > { %p629_p9 = scmp.ne.s32.totalorder %s890_s16, %s628_s4  ;;  %s633_s26 = scalar_lea.hbm %s1018_s1, 64 }
  0x37   : > { %p634_p3 = scmp.lt.u32.totalorder %s890_s16, %s1018_s1  ;;  %p635_p6 = scmp.lt.u32.totalorder %s633_s26, %s628_s4 }
  0x38   : > { %p631_p11 = pnand %p629_p9, %p600_p5  ;;  %p637_p10 = scmp.lt.u32.totalorder %s628_s4, %s890_s16 }
  0x39   : > { %p636_p4 = por %p635_p6, %p634_p3 }
  0x3a   : > { %p632_p13 = pneg %p631_p11 }
  0x3b   : > { %p638_p12 = por %p637_p10, %p636_p4 }
  0x3d   : > { %p639_p1 = pnand %p638_p12, %p632_p13 }
  0x3f   : > { %642 = shalt.err (!%p639_p1)
}
  0x40   : > { %s643_s25 = scalar_lea.vmem %s169_s19, 32  ;;  %s747_s3 = smov [#allocation5]  }
  0x41   : > { %p644_p2 = scmp.ne.s32.totalorder %s169_s19, %s643_s25  ;;  %s648_s7 = sshll.u32 %s747_s3, 4  ;;  %s649_s7 = int_to_ptr.vmem [resolvable:$false] %s648_s7 }
  0x42   : > { %s650_s8 = scalar_lea.vmem %s649_s7, 64  ;;  %p651_p8 = scmp.lt.s32.totalorder %s169_s19, %s649_s7 }
  0x43   : > { %p646_p9 = pnand %p644_p2, %p600_p5  ;;  %p652_p7 = scmp.lt.s32.totalorder %s650_s8, %s643_s25 }
  0x45   : > { %p647_p11 = pneg %p646_p9  ;;  %p653_p3 = por %p652_p7, %p651_p8 }
  0x47   : > { %p654_p6 = pnand %p653_p3, %p647_p11 }
  0x49   : > { %657 = shalt.err (!%p654_p6)
}
  0x4a   : > { %529 = dma.hbm_to_vmem [thread:$0]  (!%p845_p0), %s890_s16, 32, %s169_s19, %s155_s30  }
  0x4b   : > { %p1030_p13 = scmp.ne.s32.totalorder %s1029_s29, 0 }
  0x4c   : > { %s915_s15 = sand.u32 (!%p1030_p13), 1, %s728_s10   ;;  %p1031_p5 = scmp.ne.s32.totalorder (!%p1030_p13), %s1023_s21, 0 }
  0x4d   : > { %177 = sbr.rel (%p1030_p13) target bundleno = 195 (0xc3), region = 28  ;;  %s506_s18 = sshll.u32 (!%p1030_p13), %s915_s15, 3 }
  0x4e   : > { %s180_s4 = scalar_lea.sflag (!%p1030_p13), [#allocation3], %s915_s15  ;;  %s183_s6 = scalar_lea.vmem (!%p1030_p13), [#allocation2], %s506_s18 }
  0x54   : > { %711 = dma.done.wait (%p1031_p5), %s180_s4, 128  }
  0x55   : > { %713 = vsyncadd (%p1031_p5), %s180_s4, 4294967168  ;;  %s507_s5 = sshll.u32 %s915_s15, 1  ;;  %s189_s29 = scalar_lea.sflag [#allocation6], %s915_s15 }
  0x56   : > { %s192_s16 = scalar_lea.vmem [#allocation5], %s507_s5 }
  0x57   : > { %715 = dma.done.wait (%p1031_p5), %s189_s29, 32  }
  0x58   : > { %717 = vsyncadd (%p1031_p5), %s189_s29, 4294967264  ;;  %v224_v0 = vlaneseq  ;;  %s933_s19 = scalar_lea.vmem [#allocation7], %s507_s5  ;;  %v748_v2 = vmov 0.0   ;;  %vm234_vm1 = vcmask 1043456   ;;  %v229_v3 = vld [vmem:[%s183_s6] sm:$0xff]  ;;  %s516_s21 = sshll.u32 %s736_s12, 5 }
  0x59   : > { %v232_v4 = vcombine.high %v229_v3, %v229_v3  ;;  %v235_v5 = vsel %vm234_vm1, %v229_v3, -inf  ;;  %v230_v21 = vld [vmem:[%s192_s16] sm:$0x3]  ;;  %s388_s30 = sshll.u32 %s933_s19, 4  ;;  %s965_s27 = scalar_lea.hbm %s1019_s2, %s516_s21  ;;  %s967_s30 = int_to_ptr.vmem [resolvable:$true] %s388_s30 }
  0x5a   : > { %vm929_vm0 = vcmp.lt.s32.totalorder %v224_v0, 256  ;;  %v236_v6 = vrot.slane %v235_v5, 4  ;;  %v940_v16 = vshrl.u32 %v224_v0, 7  ;;  %vm330_vm4 = vcmp.ge.s32.totalorder %v230_v21, 0  ;;  %s374_s28 = scalar_lea.sflag [#allocation4], %s915_s15  ;;  %s658_s25 = scalar_lea.vmem %s967_s30, 32 }
  0x5b   : > { %228 = vst.msk [vmem:[%s933_s19] sm:$0x3] %vm929_vm0, %v748_v2  ;;  %v242_v7 = vsel %vm234_vm1, %v232_v4, -inf  ;;  %vm331_vm5 = vcmp.lt.s32.totalorder %v230_v21, 4  ;;  %p659_p8 = scmp.ne.s32.totalorder %s967_s30, %s658_s25  ;;  %p1034_p0 = scmp.ne.s32.totalorder %s1024_s22, 0 }
  0x5c   : > { %v237_v8 = vmax.f32 %v235_v5, %v236_v6  ;;  %v243_v9 = vrot.slane %v242_v7, 4  ;;  %v277_v20 = vsub.s32 0, %v940_v16  ;;  %v281_v23 = vsub.s32 1, %v940_v16  ;;  %vm332_vm6 = vmand %vm330_vm4, %vm331_vm5  ;;  %s751_s12 = smov [#allocation7]  }
  0x5d   : > { %p660_p7 = pnand %p659_p8, %p1034_p0  ;;  %s662_s3 = sshll.u32 %s751_s12, 4  ;;  %s663_s3 = int_to_ptr.vmem [resolvable:$false] %s662_s3 }
  0x5e   : > { %v238_v10 = vrot.slane %v237_v8, 2  ;;  %v244_v11 = vmax.f32 %v242_v7, %v243_v9  ;;  %v278_v25 = vrot.slane %v230_v21, %v277_v20  ;;  %v282_v27 = vrot.slane %v230_v21, %v281_v23  ;;  %s664_s7 = scalar_lea.vmem %s663_s3, 64  ;;  %p665_p10 = scmp.lt.s32.totalorder %s967_s30, %s663_s3 }
  0x5f   : > { %v749_v9 = vmov 0   ;;  %p661_p4 = pneg %p660_p7  ;;  %p666_p12 = scmp.lt.s32.totalorder %s664_s7, %s658_s25 }
  0x60   : > { %v239_v12 = vmax.f32 %v237_v8, %v238_v10  ;;  %v245_v13 = vrot.slane %v244_v11, 2  ;;  %vm283_vm2 = vcmp.eq.s32.totalorder %v940_v16, %v278_v25  ;;  %vm284_vm3 = vcmp.eq.s32.totalorder %v940_v16, %v282_v27 }
  0x61   : > { %v285_v28 = vsel %vm283_vm2, %v229_v3, 0.0  ;;  %v286_v29 = vsel %vm284_vm3, %v232_v4, 0.0  ;;  %v333_v10 = vsel %vm332_vm6, 1, %v749_v9  ;;  %p667_p1 = por %p666_p12, %p665_p10 }
  0x62   : > { %v240_v14 = vrot.slane %v239_v12, 1  ;;  %v246_v15 = vmax.f32 %v244_v11, %v245_v13  ;;  %v287_v30 = vsel %vm234_vm1, %v285_v28, 0.0  ;;  %v294_v31 = vsel %vm234_vm1, %v286_v29, 0.0 }
  0x63   : > { %v288_v32 = vrot.slane %v287_v30, 4  ;;  %v295_v36 = vrot.slane %v294_v31, 4  ;;  %v750_v13 = vmov 1966171168   ;;  %p668_p2 = pnand %p667_p1, %p661_p4 }
  0x64   : > { %v241_v17 = vmax.f32 %v239_v12, %v240_v14  ;;  %v247_v18 = vrot.slane %v246_v15, 1  ;;  %v337_v12 = vrot.slane %v333_v10, %v277_v20  ;;  %v353_v14 = vunpack.c.l.s4 %v750_v13 }
  0x65   : > { %v289_v39 = vadd.f32 %v288_v32, %v287_v30  ;;  %v296_v42 = vadd.f32 %v295_v36, %v294_v31  ;;  %v348_v31 = vld [vmem:[%s933_s19] sm:$0x3] }
  0x66   : > { %v248_v19 = vmax.f32 %v246_v15, %v247_v18  ;;  %v341_v18 = vrot.slane %v333_v10, %v281_v23  ;;  %vm342_vm7 = vcmp.ne.s32.totalorder %v337_v12, 0 }
  0x67   : > { %v290_v45 = vrot.slane %v289_v39, 2  ;;  %v297_v48 = vrot.slane %v296_v42, 2 }
  0x68   : > { %v251_v22 = vcombine.low %v241_v17, %v248_v19  ;;  %vm343_vm8 = vcmp.ne.s32.totalorder %v341_v18, 0 }
  0x69   : > { %v291_v51 = vadd.f32 %v290_v45, %v289_v39  ;;  %v298_v54 = vadd.f32 %v297_v48, %v296_v42 }
  0x6a   : > { %v253_v24 = vsub.f32 %v229_v3, %v251_v22  ;;  %v354_v22 = vunpack.c.0.s8 %v353_v14 }
  0x6b   : > { %v292_v56 = vrot.slane %v291_v51, 1  ;;  %v299_v57 = vrot.slane %v298_v54, 1 }
  0x6c   : > { %v254_v26 = vmul.f32 1.442695, %v253_v24  ;;  %v357_v27 = vsub.s32 %v354_v22, %v940_v16 }
  0x6d   : > { %v293_v58 = vadd.f32 %v292_v56, %v291_v51  ;;  %v300_v59 = vadd.f32 %v299_v57, %v298_v54 }
  0x6e   : > { %588 = vpow2.f32 %v254_v26 }
  0x6f   : > { %v301_v60 = vsub.f32 %v241_v17, %v293_v58  ;;  %v302_v62 = vsub.f32 %v248_v19, %v300_v59 }
  0x78   : > { %v589_v33 = vpop.eup %588 }
  0x79   : > { %v257_v34 = vcombine.high %v589_v33, %v589_v33  ;;  %v259_v35 = vsel %vm234_vm1, %v589_v33, 0.0 }
  0x7a   : > { %v260_v37 = vrot.slane %v259_v35, 4 }
  0x7b   : > { %v266_v38 = vsel %vm234_vm1, %v257_v34, 0.0 }
  0x7c   : > { %v261_v40 = vadd.f32 %v260_v37, %v259_v35  ;;  %v267_v41 = vrot.slane %v266_v38, 4 }
  0x7e   : > { %v262_v43 = vrot.slane %v261_v40, 2  ;;  %v268_v44 = vadd.f32 %v267_v41, %v266_v38 }
  0x80   : > { %v263_v46 = vadd.f32 %v262_v43, %v261_v40  ;;  %v269_v47 = vrot.slane %v268_v44, 2 }
  0x82   : > { %v264_v49 = vrot.slane %v263_v46, 1  ;;  %v270_v50 = vadd.f32 %v269_v47, %v268_v44 }
  0x84   : > { %v265_v52 = vadd.f32 %v264_v49, %v263_v46  ;;  %v271_v53 = vrot.slane %v270_v50, 1 }
  0x86   : > { %v272_v55 = vadd.f32 %v271_v53, %v270_v50  ;;  %590 = vlog2.f32 %v265_v52 }
  0x88   : > { %592 = vlog2.f32 %v272_v55 }
  0x90   : > { %v591_v61 = vpop.eup %590 }
  0x91   : > { %v304_v63 = vmul.f32 0.6931472, %v591_v61 }
  0x92   : > { %v593_v0 = vpop.eup %592 }
  0x93   : > { %v306_v2 = vmul.f32 0.6931472, %v593_v0  ;;  %v307_v3 = vadd.f32 %v304_v63, %v301_v60 }
  0x95   : > { %v308_v4 = vadd.f32 %v306_v2, %v302_v62  ;;  %v309_v5 = vsub.f32 0.0, %v307_v3 }
  0x97   : > { %v310_v6 = vsub.f32 0.0, %v308_v4  ;;  %v311_v7 = vmul.f32 1.442695, %v309_v5 }
  0x99   : > { %594 = vpow2.f32 %v311_v7  ;;  %v313_v8 = vmul.f32 1.442695, %v310_v6 }
  0x9b   : > { %596 = vpow2.f32 %v313_v8 }
  0xa3   : > { %v595_v11 = vpop.eup %594 }
  0xa4   : > { %v315_v15 = vsub.f32 1.0, %v595_v11 }
  0xa5   : > { %v597_v17 = vpop.eup %596 }
  0xa6   : > { %v316_v19 = vsub.f32 1.0, %v597_v17  ;;  %v317_v21 = vmul.f32 %v315_v15, %v315_v15 }
  0xa8   : > { %v318_v24 = vmul.f32 %v316_v19, %v316_v19  ;;  %v319_v25 = vmul.f32 %v317_v21, %v307_v3 }
  0xaa   : > { %v320_v20 = vmul.f32 %v318_v24, %v308_v4  ;;  %v346_v26 = vsel %vm342_vm7, %v319_v25, 0.0 }
  0xac   : > { %v347_v28 = vsel %vm343_vm8, %v320_v20, 0.0 }
  0xad   : > { %v351_v29 = vcombine.low %v346_v26, %v347_v28 }
  0xaf   : > { %v358_v30 = vrot.slane %v351_v29, %v357_v27 }
  0xb1   : > { %v365_v23 = vrot.slane %v358_v30, %v357_v27 }
  0xb3   : > { %v367_v32 = vadd.f32 %v365_v23, %v348_v31 }
  0xb5   : > { %372 = vst.msk [vmem:[%s933_s19] sm:$0x3] %vm929_vm0, %v367_v32 }
  0xb6   : > { %671 = shalt.err (!%p668_p2)
}
  0xb7   : > { %s672_s8 = scalar_lea.hbm %s965_s27, 32  ;;  %s676_s4 = scalar_lea.hbm %s1019_s2, 64 }
  0xb8   : > { %p673_p9 = scmp.ne.s32.totalorder %s965_s27, %s672_s8  ;;  %p677_p6 = scmp.lt.u32.totalorder %s965_s27, %s1019_s2 }
  0xb9   : > { %p678_p13 = scmp.lt.u32.totalorder %s676_s4, %s672_s8  ;;  %p680_p8 = scmp.lt.u32.totalorder %s672_s8, %s965_s27 }
  0xba   : > { %p674_p11 = pnand %p673_p9, %p1034_p0 }
  0xbb   : > { %p679_p5 = por %p678_p13, %p677_p6 }
  0xbc   : > { %p675_p3 = pneg %p674_p11 }
  0xbd   : > { %p681_p7 = por %p680_p8, %p679_p5 }
  0xbf   : > { %p682_p4 = pnand %p681_p7, %p675_p3 }
  0xc1   : > { %685 = shalt.err (!%p682_p4)
}
  0xc2   : > { %521 = dma.vmem_to_hbm [thread:$0]  (%p1034_p0), %s967_s30, 32, %s965_s27, %s374_s28  }
  0xc3 PF: > { %s400_s29 = sand.u32 1, %s724_s9   ;;  %p1035_p10 = scmp.ne.s32.totalorder %s1025_s24, 0 }
  0xc4   : > { %p1036_p12 = scmp.ge.s32.totalorder %s744_s14, 2  ;;  %s401_s16 = scalar_lea.sflag [#allocation4], %s400_s29 }
  0xc6   : > { %p531_p1 = pnand %p1036_p12, %p1035_p10 }
  0xc8   : > { %719 = dma.done.wait (!%p531_p1), %s401_s16, 32  }
  0xc9   : > { %721 = vsyncadd (!%p531_p1), %s401_s16, 4294967264  ;;  %s21_s14 = sadd.s32 1, %s744_s14   ;;  %s1037_s9 = smov %s728_s10 }
  0xca   : > { %p18_p2 = scmp.ge.s32.totalorder %s21_s14, 4   ;;  %s1038_s10 = smov %s732_s11 }
  0xcb   : > { %s1039_s11 = smov %s823_s23  ;;  %s1040_s12 = smov %s740_s13 }
  0xcc   : > { %s1041_s13 = smov %s1043_s17  ;;  %20 = sbr.rel (!%p18_p2) target bundleno = 8 (0x8), region = 90 }
  0xd3   :  { %406 = vsyncpa [#allocation3], 1 }
  0xd4   :  { %408 = vsyncpa [#allocation3 + $0x1], 1 }
  0xd5   :  { %409 = vsyncpa [#allocation6], 1 }
  0xd6   :  { %411 = vsyncpa [#allocation6 + $0x1], 1 }
  0xd7   :  { %412 = vsyncpa [#allocation4], 1 }
  0xd8   :  { %414 = vsyncpa [#allocation4 + $0x1], 1 }

</bundles_post_ra>
